<compile_context>
chip_gen: v5e
topology: v5e:2x2
jax: 0.10.0
libtpu: 0.0.40
codegen_flags: <defaults>
</compile_context>

<pallas_src>
from functools import partial

import jax
import jax.numpy as jnp
from jax.experimental import pallas as pl
from jax.experimental.pallas import tpu as pltpu

# Small compatibility shims (names moved across jax versions).
_MEM = getattr(pltpu, "MemorySpace", None) or getattr(pltpu, "TPUMemorySpace")
_VMEM_SPACE = _MEM.VMEM
_CompilerParams = getattr(pltpu, "CompilerParams", None) or getattr(
    pltpu, "TPUCompilerParams")


def msa_kernel(x_ref, wq_ref, wk_ref, wv_ref, wo_ref, b_ref, o_ref,
               k_scr, v_scr, *, heads, dim_head, q_tile, approx_recip):
    # x_ref        : (1, N, D) bf16   full sequence for the current batch element
    # wq/wk/wv_ref : (D, D)    bf16   flat projection weights, columns in (h d) order
    # wo_ref       : (H, d, D) bf16   per-head fc_out slabs
    # b_ref        : (1, D)    f32    fc_out bias
    # k_scr/v_scr  : (N, D)    bf16   VMEM scratch: K/V for the whole sequence
    H, d, tq = heads, dim_head, q_tile
    D = wq_ref.shape[1]
    qi = pl.program_id(1)

    # ---- K/V projection: once per batch element (qi == 0), reused by every
    # q-tile.  Flat lane-dense matmuls; results stored directly in bf16.
    @pl.when(qi == 0)
    def _():
        xb = x_ref[0]                                            # (N, D) bf16
        k_scr[...] = jnp.dot(
            xb, wk_ref[...], preferred_element_type=jnp.float32).astype(jnp.bfloat16)
        v_scr[...] = jnp.dot(
            xb, wv_ref[...], preferred_element_type=jnp.float32).astype(jnp.bfloat16)

    # ---- Q projection for this q-tile: flat, full-lane-width (tq, D)@(D, D).
    q_start = pl.multiple_of(qi * tq, tq)
    x_q = x_ref[0, pl.ds(q_start, tq), :]                        # (tq, D) bf16
    q = jnp.dot(x_q, wq_ref[...], preferred_element_type=jnp.float32)
    # Fold the 1/dim_head score scale into q (exact when dim_head is a power of 2).
    q = (q * (1.0 / d)).astype(jnp.bfloat16)                     # (tq, D)

    # ---- Per-head attention with fc_out fused into the head-merge:
    #   y = sum_h softmax(q_h k_h^T / d) v_h @ Wo[h]   ( == concat-heads @ Wo )
    y = jnp.zeros((tq, D), jnp.float32)
    for h in range(H):                                           # static unroll, H small
        lo = h * d
        q_h = q[:, lo:lo + d]                                    # (tq, d) bf16
        k_h = k_scr[:, lo:lo + d]                                # (N,  d) bf16
        v_h = v_scr[:, lo:lo + d]                                # (N,  d) bf16
        # scores: contraction on the last dim of both operands (no explicit k.T)
        s = jax.lax.dot_general(q_h, k_h, (((1,), (1,)), ((), ())),
                                preferred_element_type=jnp.float32)   # (tq, N) f32
        m = jnp.max(s, axis=-1, keepdims=True)
        e = jnp.exp(s - m)
        denom = jnp.sum(e, axis=-1, keepdims=True)
        if approx_recip:
            attn = e * pl.reciprocal(denom, approx=True)         # EUP slot, ~free
        else:
            attn = e / denom                                     # exact, for validation
        o_h = jnp.dot(attn.astype(jnp.bfloat16), v_h,
                      preferred_element_type=jnp.float32)        # (tq, d) f32
        # head-merge fused with fc_out: per-head (d, D) slab, f32 accumulation;
        # avoids any (H, tq, D) intermediate and keeps the output D-lane dense.
        y = y + jnp.dot(o_h.astype(jnp.bfloat16), wo_ref[h],
                        preferred_element_type=jnp.float32)      # (tq, D) f32
    o_ref[0] = (y + b_ref[...]).astype(o_ref.dtype)


def _pick_q_tile(N, target=256):
    """Largest q-tile <= target dividing N, preferring 128-/16-/8-multiples
    (bf16 packs 2 rows per sublane; 128-multiples keep MXU passes dense)."""
    if N <= target:
        return N
    for step in (128, 16, 8):
        t = (target // step) * step
        while t >= step:
            if N % t == 0:
                return t
            t -= step
    return N


def _vmem_limit_bytes(N, D, tq, out_bytes):
    """Size the scoped-VMEM budget from the actual per-step footprint, capped
    against the detected chip's physical VMEM (v7x 64 MiB, v5e/v6e 128 MiB)."""
    est = (
        2 * (N * D * 2)              # x block (bf16), double-buffered
        + 4 * D * D * 2 + D * 4      # weight slabs (single whole-array copies) + bias
        + 2 * (N * D * 2)            # K/V scratch (bf16)
        + 4 * tq * N * 4             # per-head score / exp working set (f32)
        + 4 * tq * D * 4             # q / fc_out accumulator (f32)
        + 2 * (tq * D * out_bytes)   # output block, double-buffered
    )
    limit = int(est * 1.5) + (8 << 20)
    cap = 128 << 20
    try:
        cap = pltpu.get_tpu_info().vmem_capacity_bytes
    except Exception:
        pass
    return max(32 << 20, min(limit, int(cap * 0.8), 100 << 20))


def msa_forward(x, w_qkv, w_out, b_out, *, heads, q_tile=256, approx_recip=True):
    """x: (B, N, D); w_qkv: (D, 3D); w_out: (D, D); b_out: (1, D).
    Weights are (in_features, out_features): y = x @ W (+ b)."""
    B, N, D = x.shape
    H = heads
    d = D // heads
    assert D % heads == 0, "dim must be divisible by heads"

    # Flat projection weights (full D-wide lane-dense outputs).  qkv column
    # order is [q | k | v], each already in torch's (h d) order.
    w_q = w_qkv[:, 0 * D:1 * D].astype(jnp.bfloat16)       # (D, D)
    w_k = w_qkv[:, 1 * D:2 * D].astype(jnp.bfloat16)       # (D, D)
    w_v = w_qkv[:, 2 * D:3 * D].astype(jnp.bfloat16)       # (D, D)
    # fc_out split per head so 'b h n d -> b n (h d)' + @W_out fuses into the
    # per-head (d, D) matmul accumulation (no concat of activations).
    w_o = w_out.reshape(H, d, D).astype(jnp.bfloat16)      # (H, d, D)
    b_o = b_out.reshape(1, D).astype(jnp.float32)

    # bf16 activations into the kernel; output keeps the caller's dtype.
    x_bf16 = x.astype(jnp.bfloat16)
    out_dtype = x.dtype

    tq = _pick_q_tile(N, q_tile)
    n_q = N // tq

    kernel = partial(msa_kernel, heads=H, dim_head=d, q_tile=tq,
                     approx_recip=approx_recip)

    # Grid-invariant operands: single whole-array VMEM residents (no dead
    # double-buffering of blocks that are fetched exactly once).
    const_spec = pl.BlockSpec(memory_space=_VMEM_SPACE)

    # TODO(synk): for very long N (esp. on v7x's 64 MiB VMEM) add a K-tile grid
    # axis with flash-style online softmax instead of the full-N score block.
    # TODO(synk): optional int8 (v6e) / fp8 (v7x) weight quantization with fused dequant.
    return pl.pallas_call(
        kernel,
        out_shape=jax.ShapeDtypeStruct((B, N, D), out_dtype),
        grid_spec=pltpu.PrefetchScalarGridSpec(
            num_scalar_prefetch=0,
            grid=(B, n_q),
            in_specs=[
                # Full sequence for this batch element; q rows are sliced
                # in-kernel, so x is DMA'd from HBM once per batch element.
                pl.BlockSpec((1, N, D), lambda b, qi: (b, 0, 0)),
                const_spec,   # w_q
                const_spec,   # w_k
                const_spec,   # w_v
                const_spec,   # w_o
                const_spec,   # bias
            ],
            out_specs=pl.BlockSpec((1, tq, D), lambda b, qi: (b, qi, 0)),
            scratch_shapes=[
                pltpu.VMEM((N, D), jnp.bfloat16),   # K for the whole sequence
                pltpu.VMEM((N, D), jnp.bfloat16),   # V for the whole sequence
            ],
        ),
        compiler_params=_CompilerParams(
            # Batch axis is independent (megacore-shardable); q-tile axis is
            # "arbitrary" because the K/V scratch carries across q-tiles.
            dimension_semantics=("parallel", "arbitrary"),
            vmem_limit_bytes=_vmem_limit_bytes(
                N, D, tq, jnp.dtype(out_dtype).itemsize),
        ),
    )(x_bf16, w_q, w_k, w_v, w_o, b_o)


def msa_reference(x, w_qkv, w_out, b_out, *, heads):
    """Pure-JAX f32 reference mirroring the PyTorch forward."""
    B, N, D = x.shape
    d = D // heads
    qkv = x @ w_qkv                                   # (B, N, 3D)
    q, k, v = jnp.split(qkv, 3, axis=-1)

    def split_heads(t):                               # b n (h d) -> b h n d
        return t.reshape(B, N, heads, d).transpose(0, 2, 1, 3)

    q, k, v = map(split_heads, (q, k, v))
    dots = jnp.einsum('bhid,bhjd->bhij', q, k) / d
    attn = jax.nn.softmax(dots, axis=-1)
    out = jnp.einsum('bhij,bhjd->bhid', attn, v)
    out = out.transpose(0, 2, 1, 3).reshape(B, N, D)  # b h n d -> b n (h d)
    return out @ w_out + b_out


def _run_case(key, B, N, dim, heads, q_tile):
    kx, kq, kw, kb = jax.random.split(key, 4)
    x = jax.random.normal(kx, (B, N, dim), dtype=jnp.float32)
    w_qkv = jax.random.normal(kq, (dim, 3 * dim), dtype=jnp.float32) * 0.02
    w_out = jax.random.normal(kw, (dim, dim), dtype=jnp.float32) * 0.02
    b_out = jax.random.normal(kb, (1, dim), dtype=jnp.float32) * 0.02

    y = jax.block_until_ready(
        msa_forward(x, w_qkv, w_out, b_out, heads=heads, q_tile=q_tile))
    y_ref = msa_reference(x, w_qkv, w_out, b_out, heads=heads)
    assert y.shape == (B, N, dim)
    assert y.dtype == x.dtype
    # bf16 MXU inputs (f32 accumulation) + approx reciprocal -> bf16 tolerance.
    assert jnp.allclose(y, y_ref, atol=2e-2, rtol=2e-2), \
        f"mismatch vs reference (B={B}, N={N}, dim={dim}, heads={heads})"


if __name__ == "__main__":
    key = jax.random.PRNGKey(0)
    k1, k2 = jax.random.split(key)
    # Small shape consistent with the module (B=2, seq=8, dim=32, heads=4).
    _run_case(k1, B=2, N=8, dim=32, heads=4, q_tile=256)
    # Multi-q-tile path: exercises the K/V-scratch reuse across q-tiles.
    _run_case(k2, B=1, N=256, dim=128, heads=4, q_tile=128)
    print("KERNEL_OK")
</pallas_src>

<mosaic_0001>
module attributes {stable_mosaic.version = 11 : i64} {
  func.func @msa_kernel(%arg0: i32, %arg1: i32, %arg2: memref<1x8x32xbf16, #tpu.memory_space<vmem>>, %arg3: memref<32x32xbf16, #tpu.memory_space<vmem>>, %arg4: memref<32x32xbf16, #tpu.memory_space<vmem>>, %arg5: memref<32x32xbf16, #tpu.memory_space<vmem>>, %arg6: memref<4x8x32xbf16, #tpu.memory_space<vmem>>, %arg7: memref<1x32xf32, #tpu.memory_space<vmem>>, %arg8: memref<1x8x32xf32, #tpu.memory_space<vmem>>, %arg9: memref<8x32xbf16, #tpu.memory_space<vmem>>, %arg10: memref<8x32xbf16, #tpu.memory_space<vmem>>) attributes {dimension_semantics = [#tpu.dimension_semantics<parallel>, #tpu.dimension_semantics<arbitrary>], iteration_bounds = array<i64: 2, 1>, scalar_prefetch = 0 : i64, scratch_operands = 2 : i64, tpu.core_type = #tpu.core_type<tc>, window_params = [{transform_indices = @transform_0, window_bounds = array<i64: 1, 8, 32>}, {pipeline_mode = #tpu.pipeline_mode<synchronous>, transform_indices = @transform_1, window_bounds = array<i64: 32, 32>}, {pipeline_mode = #tpu.pipeline_mode<synchronous>, transform_indices = @transform_2, window_bounds = array<i64: 32, 32>}, {pipeline_mode = #tpu.pipeline_mode<synchronous>, transform_indices = @transform_3, window_bounds = array<i64: 32, 32>}, {pipeline_mode = #tpu.pipeline_mode<synchronous>, transform_indices = @transform_4, window_bounds = array<i64: 4, 8, 32>}, {pipeline_mode = #tpu.pipeline_mode<synchronous>, transform_indices = @transform_5, window_bounds = array<i64: 1, 32>}, {transform_indices = @transform_6, window_bounds = array<i64: 1, 8, 32>}]} {
    %c0_i32 = arith.constant 0 : i32
    %0 = arith.cmpi eq, %arg1, %c0_i32 : i32
    %1 = arith.extui %0 : i1 to i32
    %c0_i32_0 = arith.constant 0 : i32
    %2 = arith.cmpi ne, %1, %c0_i32_0 : i32
    scf.if %2 {
      %c0_53 = arith.constant 0 : index
      %c0_54 = arith.constant 0 : index
      %c0_55 = arith.constant 0 : index
      %104 = vector.load %arg2[%c0_53, %c0_54, %c0_55] : memref<1x8x32xbf16, #tpu.memory_space<vmem>>, vector<1x8x32xbf16>
      %105 = vector.shape_cast %104 : vector<1x8x32xbf16> to vector<8x32xbf16>
      %c0_56 = arith.constant 0 : index
      %c0_57 = arith.constant 0 : index
      %106 = vector.load %arg4[%c0_56, %c0_57] : memref<32x32xbf16, #tpu.memory_space<vmem>>, vector<32x32xbf16>
      %cst_58 = arith.constant dense<0.000000e+00> : vector<8x32xf32>
      %107 = tpu.matmul %105, %106, %cst_58 {dimension_numbers = #tpu.dot_dimension_numbers<[1], [0], [0], [1], [0, 0, 1, 1], [], []>} : vector<8x32xbf16>, vector<32x32xbf16>, vector<8x32xf32> -> vector<8x32xf32>
      %108 = arith.truncf %107 : vector<8x32xf32> to vector<8x32xbf16>
      %c0_59 = arith.constant 0 : index
      %c0_60 = arith.constant 0 : index
      %109 = vector.load %arg9[%c0_59, %c0_60] : memref<8x32xbf16, #tpu.memory_space<vmem>>, vector<8x32xbf16>
      tpu.vector_store %arg9[%c0_59, %c0_60], %108 {strides = array<i32>} : memref<8x32xbf16, #tpu.memory_space<vmem>>, vector<8x32xbf16>,
      %c0_61 = arith.constant 0 : index
      %c0_62 = arith.constant 0 : index
      %110 = vector.load %arg5[%c0_61, %c0_62] : memref<32x32xbf16, #tpu.memory_space<vmem>>, vector<32x32xbf16>
      %cst_63 = arith.constant dense<0.000000e+00> : vector<8x32xf32>
      %111 = tpu.matmul %105, %110, %cst_63 {dimension_numbers = #tpu.dot_dimension_numbers<[1], [0], [0], [1], [0, 0, 1, 1], [], []>} : vector<8x32xbf16>, vector<32x32xbf16>, vector<8x32xf32> -> vector<8x32xf32>
      %112 = arith.truncf %111 : vector<8x32xf32> to vector<8x32xbf16>
      %c0_64 = arith.constant 0 : index
      %c0_65 = arith.constant 0 : index
      %113 = vector.load %arg10[%c0_64, %c0_65] : memref<8x32xbf16, #tpu.memory_space<vmem>>, vector<8x32xbf16>
      tpu.vector_store %arg10[%c0_64, %c0_65], %112 {strides = array<i32>} : memref<8x32xbf16, #tpu.memory_space<vmem>>, vector<8x32xbf16>,
    } else {
    }
    %c8_i32 = arith.constant 8 : i32
    %3 = arith.muli %arg1, %c8_i32 : i32
    %4 = tpu.assume_multiple %3, 8 : i32
    %c0 = arith.constant 0 : index
    %5 = arith.index_cast %4 : i32 to index
    %c0_1 = arith.constant 0 : index
    %6 = vector.load %arg2[%c0, %5, %c0_1] : memref<1x8x32xbf16, #tpu.memory_space<vmem>>, vector<1x8x32xbf16>
    %7 = vector.shape_cast %6 : vector<1x8x32xbf16> to vector<8x32xbf16>
    %c0_2 = arith.constant 0 : index
    %c0_3 = arith.constant 0 : index
    %8 = vector.load %arg3[%c0_2, %c0_3] : memref<32x32xbf16, #tpu.memory_space<vmem>>, vector<32x32xbf16>
    %cst = arith.constant dense<0.000000e+00> : vector<8x32xf32>
    %9 = tpu.matmul %7, %8, %cst {dimension_numbers = #tpu.dot_dimension_numbers<[1], [0], [0], [1], [0, 0, 1, 1], [], []>} : vector<8x32xbf16>, vector<32x32xbf16>, vector<8x32xf32> -> vector<8x32xf32>
    %cst_4 = arith.constant 1.250000e-01 : f32
    %10 = vector.broadcast %cst_4 : f32 to vector<8x32xf32>
    %11 = arith.mulf %9, %10 : vector<8x32xf32>
    %12 = arith.truncf %11 : vector<8x32xf32> to vector<8x32xbf16>
    %cst_5 = arith.constant 0.000000e+00 : f32
    %13 = vector.broadcast %cst_5 : f32 to vector<8x32xf32>
    %14 = vector.extract_strided_slice %12 {offsets = [0, 0], sizes = [8, 8], strides = [1, 1]} : vector<8x32xbf16> to vector<8x8xbf16>
    %c0_6 = arith.constant 0 : index
    %c0_7 = arith.constant 0 : index
    %15 = vector.load %arg9[%c0_6, %c0_7] : memref<8x32xbf16, #tpu.memory_space<vmem>>, vector<8x8xbf16>
    %c0_8 = arith.constant 0 : index
    %c0_9 = arith.constant 0 : index
    %16 = vector.load %arg10[%c0_8, %c0_9] : memref<8x32xbf16, #tpu.memory_space<vmem>>, vector<8x8xbf16>
    %cst_10 = arith.constant dense<0.000000e+00> : vector<8x8xf32>
    %17 = tpu.matmul %14, %15, %cst_10 {dimension_numbers = #tpu.dot_dimension_numbers<[1], [1], [0], [0], [0, 0, 1, 0], [], []>} : vector<8x8xbf16>, vector<8x8xbf16>, vector<8x8xf32> -> vector<8x8xf32>
    %cst_11 = arith.constant dense<0xFF800000> : vector<8xf32>
    %18 = vector.multi_reduction <maximumf>, %17, %cst_11 [1] : vector<8x8xf32> to vector<8xf32>
    %19 = vector.shape_cast %18 : vector<8xf32> to vector<8x1xf32>
    %20 = vector.broadcast %19 : vector<8x1xf32> to vector<8x8xf32>
    %21 = arith.subf %17, %20 : vector<8x8xf32>
    %22 = math.exp %21 : vector<8x8xf32>
    %cst_12 = arith.constant dense<0.000000e+00> : vector<8xf32>
    %23 = vector.multi_reduction <add>, %22, %cst_12 [1] : vector<8x8xf32> to vector<8xf32>
    %24 = vector.shape_cast %23 : vector<8xf32> to vector<8x1xf32>
    %25 = tpu.reciprocal %24 {approx = true} : vector<8x1xf32> -> vector<8x1xf32>
    %26 = vector.broadcast %25 : vector<8x1xf32> to vector<8x8xf32>
    %27 = arith.mulf %22, %26 : vector<8x8xf32>
    %28 = arith.truncf %27 : vector<8x8xf32> to vector<8x8xbf16>
    %cst_13 = arith.constant dense<0.000000e+00> : vector<8x8xf32>
    %29 = tpu.matmul %28, %16, %cst_13 {dimension_numbers = #tpu.dot_dimension_numbers<[1], [0], [0], [1], [0, 0, 1, 1], [], []>} : vector<8x8xbf16>, vector<8x8xbf16>, vector<8x8xf32> -> vector<8x8xf32>
    %30 = arith.truncf %29 : vector<8x8xf32> to vector<8x8xbf16>
    %c0_14 = arith.constant 0 : index
    %c0_15 = arith.constant 0 : index
    %c0_16 = arith.constant 0 : index
    %31 = vector.load %arg6[%c0_14, %c0_15, %c0_16] : memref<4x8x32xbf16, #tpu.memory_space<vmem>>, vector<1x8x32xbf16>
    %32 = vector.shape_cast %31 : vector<1x8x32xbf16> to vector<8x32xbf16>
    %cst_17 = arith.constant dense<0.000000e+00> : vector<8x32xf32>
    %33 = tpu.matmul %30, %32, %cst_17 {dimension_numbers = #tpu.dot_dimension_numbers<[1], [0], [0], [1], [0, 0, 1, 1], [], []>} : vector<8x8xbf16>, vector<8x32xbf16>, vector<8x32xf32> -> vector<8x32xf32>
    %34 = arith.addf %13, %33 : vector<8x32xf32>
    %35 = vector.extract_strided_slice %12 {offsets = [0, 8], sizes = [8, 8], strides = [1, 1]} : vector<8x32xbf16> to vector<8x8xbf16>
    %c0_18 = arith.constant 0 : index
    %c8 = arith.constant 8 : index
    %36 = vector.load %arg9[%c0_18, %c8] : memref<8x32xbf16, #tpu.memory_space<vmem>>, vector<8x8xbf16>
    %c0_19 = arith.constant 0 : index
    %c8_20 = arith.constant 8 : index
    %37 = vector.load %arg10[%c0_19, %c8_20] : memref<8x32xbf16, #tpu.memory_space<vmem>>, vector<8x8xbf16>
    %cst_21 = arith.constant dense<0.000000e+00> : vector<8x8xf32>
    %38 = tpu.matmul %35, %36, %cst_21 {dimension_numbers = #tpu.dot_dimension_numbers<[1], [1], [0], [0], [0, 0, 1, 0], [], []>} : vector<8x8xbf16>, vector<8x8xbf16>, vector<8x8xf32> -> vector<8x8xf32>
    %cst_22 = arith.constant dense<0xFF800000> : vector<8xf32>
    %39 = vector.multi_reduction <maximumf>, %38, %cst_22 [1] : vector<8x8xf32> to vector<8xf32>
    %40 = vector.shape_cast %39 : vector<8xf32> to vector<8x1xf32>
    %41 = vector.broadcast %40 : vector<8x1xf32> to vector<8x8xf32>
    %42 = arith.subf %38, %41 : vector<8x8xf32>
    %43 = math.exp %42 : vector<8x8xf32>
    %cst_23 = arith.constant dense<0.000000e+00> : vector<8xf32>
    %44 = vector.multi_reduction <add>, %43, %cst_23 [1] : vector<8x8xf32> to vector<8xf32>
    %45 = vector.shape_cast %44 : vector<8xf32> to vector<8x1xf32>
    %46 = tpu.reciprocal %45 {approx = true} : vector<8x1xf32> -> vector<8x1xf32>
    %47 = vector.broadcast %46 : vector<8x1xf32> to vector<8x8xf32>
    %48 = arith.mulf %43, %47 : vector<8x8xf32>
    %49 = arith.truncf %48 : vector<8x8xf32> to vector<8x8xbf16>
    %cst_24 = arith.constant dense<0.000000e+00> : vector<8x8xf32>
    %50 = tpu.matmul %49, %37, %cst_24 {dimension_numbers = #tpu.dot_dimension_numbers<[1], [0], [0], [1], [0, 0, 1, 1], [], []>} : vector<8x8xbf16>, vector<8x8xbf16>, vector<8x8xf32> -> vector<8x8xf32>
    %51 = arith.truncf %50 : vector<8x8xf32> to vector<8x8xbf16>
    %c1 = arith.constant 1 : index
    %c0_25 = arith.constant 0 : index
    %c0_26 = arith.constant 0 : index
    %52 = vector.load %arg6[%c1, %c0_25, %c0_26] : memref<4x8x32xbf16, #tpu.memory_space<vmem>>, vector<1x8x32xbf16>
    %53 = vector.shape_cast %52 : vector<1x8x32xbf16> to vector<8x32xbf16>
    %cst_27 = arith.constant dense<0.000000e+00> : vector<8x32xf32>
    %54 = tpu.matmul %51, %53, %cst_27 {dimension_numbers = #tpu.dot_dimension_numbers<[1], [0], [0], [1], [0, 0, 1, 1], [], []>} : vector<8x8xbf16>, vector<8x32xbf16>, vector<8x32xf32> -> vector<8x32xf32>
    %55 = arith.addf %34, %54 : vector<8x32xf32>
    %56 = vector.extract_strided_slice %12 {offsets = [0, 16], sizes = [8, 8], strides = [1, 1]} : vector<8x32xbf16> to vector<8x8xbf16>
    %c0_28 = arith.constant 0 : index
    %c16 = arith.constant 16 : index
    %57 = vector.load %arg9[%c0_28, %c16] : memref<8x32xbf16, #tpu.memory_space<vmem>>, vector<8x8xbf16>
    %c0_29 = arith.constant 0 : index
    %c16_30 = arith.constant 16 : index
    %58 = vector.load %arg10[%c0_29, %c16_30] : memref<8x32xbf16, #tpu.memory_space<vmem>>, vector<8x8xbf16>
    %cst_31 = arith.constant dense<0.000000e+00> : vector<8x8xf32>
    %59 = tpu.matmul %56, %57, %cst_31 {dimension_numbers = #tpu.dot_dimension_numbers<[1], [1], [0], [0], [0, 0, 1, 0], [], []>} : vector<8x8xbf16>, vector<8x8xbf16>, vector<8x8xf32> -> vector<8x8xf32>
    %cst_32 = arith.constant dense<0xFF800000> : vector<8xf32>
    %60 = vector.multi_reduction <maximumf>, %59, %cst_32 [1] : vector<8x8xf32> to vector<8xf32>
    %61 = vector.shape_cast %60 : vector<8xf32> to vector<8x1xf32>
    %62 = vector.broadcast %61 : vector<8x1xf32> to vector<8x8xf32>
    %63 = arith.subf %59, %62 : vector<8x8xf32>
    %64 = math.exp %63 : vector<8x8xf32>
    %cst_33 = arith.constant dense<0.000000e+00> : vector<8xf32>
    %65 = vector.multi_reduction <add>, %64, %cst_33 [1] : vector<8x8xf32> to vector<8xf32>
    %66 = vector.shape_cast %65 : vector<8xf32> to vector<8x1xf32>
    %67 = tpu.reciprocal %66 {approx = true} : vector<8x1xf32> -> vector<8x1xf32>
    %68 = vector.broadcast %67 : vector<8x1xf32> to vector<8x8xf32>
    %69 = arith.mulf %64, %68 : vector<8x8xf32>
    %70 = arith.truncf %69 : vector<8x8xf32> to vector<8x8xbf16>
    %cst_34 = arith.constant dense<0.000000e+00> : vector<8x8xf32>
    %71 = tpu.matmul %70, %58, %cst_34 {dimension_numbers = #tpu.dot_dimension_numbers<[1], [0], [0], [1], [0, 0, 1, 1], [], []>} : vector<8x8xbf16>, vector<8x8xbf16>, vector<8x8xf32> -> vector<8x8xf32>
    %72 = arith.truncf %71 : vector<8x8xf32> to vector<8x8xbf16>
    %c2 = arith.constant 2 : index
    %c0_35 = arith.constant 0 : index
    %c0_36 = arith.constant 0 : index
    %73 = vector.load %arg6[%c2, %c0_35, %c0_36] : memref<4x8x32xbf16, #tpu.memory_space<vmem>>, vector<1x8x32xbf16>
    %74 = vector.shape_cast %73 : vector<1x8x32xbf16> to vector<8x32xbf16>
    %cst_37 = arith.constant dense<0.000000e+00> : vector<8x32xf32>
    %75 = tpu.matmul %72, %74, %cst_37 {dimension_numbers = #tpu.dot_dimension_numbers<[1], [0], [0], [1], [0, 0, 1, 1], [], []>} : vector<8x8xbf16>, vector<8x32xbf16>, vector<8x32xf32> -> vector<8x32xf32>
    %76 = arith.addf %55, %75 : vector<8x32xf32>
    %77 = vector.extract_strided_slice %12 {offsets = [0, 24], sizes = [8, 8], strides = [1, 1]} : vector<8x32xbf16> to vector<8x8xbf16>
    %c0_38 = arith.constant 0 : index
    %c24 = arith.constant 24 : index
    %78 = vector.load %arg9[%c0_38, %c24] : memref<8x32xbf16, #tpu.memory_space<vmem>>, vector<8x8xbf16>
    %c0_39 = arith.constant 0 : index
    %c24_40 = arith.constant 24 : index
    %79 = vector.load %arg10[%c0_39, %c24_40] : memref<8x32xbf16, #tpu.memory_space<vmem>>, vector<8x8xbf16>
    %cst_41 = arith.constant dense<0.000000e+00> : vector<8x8xf32>
    %80 = tpu.matmul %77, %78, %cst_41 {dimension_numbers = #tpu.dot_dimension_numbers<[1], [1], [0], [0], [0, 0, 1, 0], [], []>} : vector<8x8xbf16>, vector<8x8xbf16>, vector<8x8xf32> -> vector<8x8xf32>
    %cst_42 = arith.constant dense<0xFF800000> : vector<8xf32>
    %81 = vector.multi_reduction <maximumf>, %80, %cst_42 [1] : vector<8x8xf32> to vector<8xf32>
    %82 = vector.shape_cast %81 : vector<8xf32> to vector<8x1xf32>
    %83 = vector.broadcast %82 : vector<8x1xf32> to vector<8x8xf32>
    %84 = arith.subf %80, %83 : vector<8x8xf32>
    %85 = math.exp %84 : vector<8x8xf32>
    %cst_43 = arith.constant dense<0.000000e+00> : vector<8xf32>
    %86 = vector.multi_reduction <add>, %85, %cst_43 [1] : vector<8x8xf32> to vector<8xf32>
    %87 = vector.shape_cast %86 : vector<8xf32> to vector<8x1xf32>
    %88 = tpu.reciprocal %87 {approx = true} : vector<8x1xf32> -> vector<8x1xf32>
    %89 = vector.broadcast %88 : vector<8x1xf32> to vector<8x8xf32>
    %90 = arith.mulf %85, %89 : vector<8x8xf32>
    %91 = arith.truncf %90 : vector<8x8xf32> to vector<8x8xbf16>
    %cst_44 = arith.constant dense<0.000000e+00> : vector<8x8xf32>
    %92 = tpu.matmul %91, %79, %cst_44 {dimension_numbers = #tpu.dot_dimension_numbers<[1], [0], [0], [1], [0, 0, 1, 1], [], []>} : vector<8x8xbf16>, vector<8x8xbf16>, vector<8x8xf32> -> vector<8x8xf32>
    %93 = arith.truncf %92 : vector<8x8xf32> to vector<8x8xbf16>
    %c3 = arith.constant 3 : index
    %c0_45 = arith.constant 0 : index
    %c0_46 = arith.constant 0 : index
    %94 = vector.load %arg6[%c3, %c0_45, %c0_46] : memref<4x8x32xbf16, #tpu.memory_space<vmem>>, vector<1x8x32xbf16>
    %95 = vector.shape_cast %94 : vector<1x8x32xbf16> to vector<8x32xbf16>
    %cst_47 = arith.constant dense<0.000000e+00> : vector<8x32xf32>
    %96 = tpu.matmul %93, %95, %cst_47 {dimension_numbers = #tpu.dot_dimension_numbers<[1], [0], [0], [1], [0, 0, 1, 1], [], []>} : vector<8x8xbf16>, vector<8x32xbf16>, vector<8x32xf32> -> vector<8x32xf32>
    %97 = arith.addf %76, %96 : vector<8x32xf32>
    %c0_48 = arith.constant 0 : index
    %c0_49 = arith.constant 0 : index
    %98 = vector.load %arg7[%c0_48, %c0_49] : memref<1x32xf32, #tpu.memory_space<vmem>>, vector<1x32xf32>
    %99 = vector.broadcast %98 : vector<1x32xf32> to vector<8x32xf32>
    %100 = arith.addf %97, %99 : vector<8x32xf32>
    %c0_50 = arith.constant 0 : index
    %c0_51 = arith.constant 0 : index
    %c0_52 = arith.constant 0 : index
    %101 = vector.load %arg8[%c0_50, %c0_51, %c0_52] : memref<1x8x32xf32, #tpu.memory_space<vmem>>, vector<1x8x32xf32>
    %102 = vector.shape_cast %101 : vector<1x8x32xf32> to vector<8x32xf32>
    %103 = vector.shape_cast %100 : vector<8x32xf32> to vector<1x8x32xf32>
    tpu.vector_store %arg8[%c0_50, %c0_51, %c0_52], %103 {strides = array<i32>} : memref<1x8x32xf32, #tpu.memory_space<vmem>>, vector<1x8x32xf32>,
    return
  }
  func.func @transform_0(%arg0: i32, %arg1: i32) -> (i32, i32, i32) {
    %c0_i32 = arith.constant 0 : i32
    %c0_i32_0 = arith.constant 0 : i32
    %c0_i32_1 = arith.constant 0 : i32
    return %arg0, %c0_i32, %c0_i32_0 : i32, i32, i32
  }
  func.func @transform_1(%arg0: i32, %arg1: i32) -> (i32, i32) {
    %c0_i32 = arith.constant 0 : i32
    %c0_i32_0 = arith.constant 0 : i32
    %c0_i32_1 = arith.constant 0 : i32
    return %c0_i32, %c0_i32_0 : i32, i32
  }
  func.func @transform_2(%arg0: i32, %arg1: i32) -> (i32, i32) {
    %c0_i32 = arith.constant 0 : i32
    %c0_i32_0 = arith.constant 0 : i32
    %c0_i32_1 = arith.constant 0 : i32
    return %c0_i32, %c0_i32_0 : i32, i32
  }
  func.func @transform_3(%arg0: i32, %arg1: i32) -> (i32, i32) {
    %c0_i32 = arith.constant 0 : i32
    %c0_i32_0 = arith.constant 0 : i32
    %c0_i32_1 = arith.constant 0 : i32
    return %c0_i32, %c0_i32_0 : i32, i32
  }
  func.func @transform_4(%arg0: i32, %arg1: i32) -> (i32, i32, i32) {
    %c0_i32 = arith.constant 0 : i32
    %c0_i32_0 = arith.constant 0 : i32
    %c0_i32_1 = arith.constant 0 : i32
    %c0_i32_2 = arith.constant 0 : i32
    return %c0_i32, %c0_i32_0, %c0_i32_1 : i32, i32, i32
  }
  func.func @transform_5(%arg0: i32, %arg1: i32) -> (i32, i32) {
    %c0_i32 = arith.constant 0 : i32
    %c0_i32_0 = arith.constant 0 : i32
    %c0_i32_1 = arith.constant 0 : i32
    return %c0_i32, %c0_i32_0 : i32, i32
  }
  func.func @transform_6(%arg0: i32, %arg1: i32) -> (i32, i32, i32) {
    %c0_i32 = arith.constant 0 : i32
    %c0_i32_0 = arith.constant 0 : i32
    return %arg0, %arg1, %c0_i32 : i32, i32, i32
  }
}

</mosaic_0001>

<bundles_post_ra>
// kernel: tpu_custom_call.1
= control target key start
LH: loop header
LB: loop body
LE: loop exit
PB: predicated region body
PF: predicated region fallthrough
CT: control target
= control target key end

     0   :  { %s1619_s0 = inlined_call_operand.hbm [shape: bf16[2,8,32], index: 0, kind: input, shape index: {}]   ;;  %s1620_s1 = inlined_call_operand.hbm [shape: bf16[32,32], index: 1, kind: input, shape index: {}]   ;;  %s1621_s2 = inlined_call_operand.hbm [shape: bf16[32,32], index: 2, kind: input, shape index: {}]   ;;  %s1622_s3 = inlined_call_operand.hbm [shape: bf16[32,32], index: 3, kind: input, shape index: {}]   ;;  %s1623_s4 = inlined_call_operand.hbm [shape: bf16[4,8,32], index: 4, kind: input, shape index: {}]   ;;  %s1624_s5 = inlined_call_operand.vmem [shape: f32[1,32], index: 5, kind: input, shape index: {}]   ;;  %s1625_s6 = inlined_call_operand.hbm [shape: f32[2,8,32], index: 6, kind: output, shape index: {}]  }
   0x1   :  { %1626 = sst [smem:[#allocation18_spill]] %s1620_s1 }
   0x2   :  { %11 = vsyncpa [#allocation5], 0 }
   0x3   :  { %13 = vsyncpa [#allocation5 + $0x1], 0 }
   0x4   :  { %14 = vsyncpa [#allocation8], 0 }
   0x5   :  { %15 = vsyncpa [#allocation11], 0 }
   0x6   :  { %16 = vsyncpa [#allocation6], 0 }
   0x7   :  { %18 = vsyncpa [#allocation6 + $0x1], 0  ;;  %s1402_s21 = smov 0   ;;  %s1404_s22 = smov 0  }
   0x8   :  { %s1406_s23 = smov 0   ;;  %s1408_s24 = smov 0  }
   0x9   :  { %s1410_s25 = smov 0   ;;  %s1412_s26 = smov 0  }
   0xa LB: > { %s925_s27 = sadd.s32 4294967295, %s1356_s26   ;;  %p927_p0 = scmp.ge.s32.totalorder %s1356_s26, 1  ;;  %s1356_s26 = sphi %s1412_s26, %s24_s26   ;;  %s1352_s25 = sphi %s1410_s25, %s1638_s25   ;;  %s1348_s24 = sphi %s1408_s24, %s1637_s24   ;;  %s1344_s23 = sphi %s1406_s23, %s1636_s23   ;;  %s1340_s22 = sphi %s1404_s22, %s1635_s22   ;;  %s1336_s21 = sphi %s1402_s21, %s1634_s21  }
   0xb   : > { %p1436_p1 = scmp.eq.s32.totalorder %s925_s27, 0  ;;  %p200_p2 = scmp.lt.s32.totalorder %s1356_s26, 3 }
   0xc   : > { %s1628_s1 = sld [smem:[#allocation18_spill]]  ;;  %s1358_s9 = smov [#allocation7]  }
   0xd   : > { %p1444_p3 = pnand %p927_p0, %p200_p2  ;;  %s213_s10 = sshll.u32 %s1358_s9, 4  ;;  %s214_s10 = int_to_ptr.vmem [resolvable:$true] %s213_s10 }
   0xe   : > { %p932_p6 = scmp.ge.s32.totalorder %s1356_s26, 2  ;;  %s239_s14 = sshll.u32 %s1622_s3, 4  ;;  %s240_s14 = int_to_ptr.hbm [resolvable:$true] %s239_s14 }
   0xf   : > { %p1011_p4 = pneg %p1444_p3  ;;  %s1359_s15 = smov 64  }
  0x10   : > { %s1360_s16 = smov 4   ;;  %s1361_s17 = smov [#allocation10]  }
  0x11   : > { %p1452_p5 = pnand %p1011_p4, %p1436_p1  ;;  %s241_s18 = sshll.u32 %s1361_s17, 4  ;;  %s242_s18 = int_to_ptr.vmem [resolvable:$true] %s241_s18 }
  0x12   : > { %s211_s7 = sshll.u32 %s1628_s1, 4  ;;  %s225_s29 = sshll.u32 %s1621_s2, 4  ;;  %s212_s7 = int_to_ptr.hbm [resolvable:$true] %s211_s7  ;;  %s226_s29 = int_to_ptr.hbm [resolvable:$true] %s225_s29 }
  0x13   : > { %1014 = dma.hbm_to_vmem [thread:$0]  (!%p1452_p5), %s212_s7, 256, %s214_s10, [#allocation8], %s1359_s15, %s1359_s15, %s1360_s16  }
  0x14   : > { %1020 = dma.hbm_to_vmem [thread:$0]  (!%p1452_p5), %s240_s14, 256, %s242_s18, [#allocation11], %s1359_s15, %s1359_s15, %s1360_s16  }
  0x15   : > { %s253_s7 = sshll.u32 %s1623_s4, 4  ;;  %s1362_s10 = smov [#allocation9]   ;;  %s254_s7 = int_to_ptr.hbm [resolvable:$true] %s253_s7 }
  0x16   : > { %s227_s12 = sshll.u32 %s1362_s10, 4  ;;  %s1363_s13 = smov [#allocation12]   ;;  %s228_s12 = int_to_ptr.vmem [resolvable:$true] %s227_s12 }
  0x17   : > { %1017 = dma.hbm_to_vmem [thread:$0]  (!%p1452_p5), %s226_s29, 256, %s228_s12, [#allocation8], %s1359_s15, %s1359_s15, %s1360_s16  }
  0x18   : > { %s255_s17 = sshll.u32 %s1363_s13, 4  ;;  %s36_s14 = sadd.s32 1, %s1352_s25  ;;  %s256_s17 = int_to_ptr.vmem [resolvable:$true] %s255_s17 }
  0x19   : > { %1023 = dma.hbm_to_vmem [thread:$0]  (!%p1452_p5), %s254_s7, 256, %s256_s17, [#allocation11], %s1359_s15, %s1359_s15, %s1360_s16  }
  0x1a   : > { %s926_s18 = sadd.s32 4294967294, %s1356_s26   ;;  %p38_p7 = scmp.ge.s32.totalorder %s36_s14, 2 }
  0x1b   : > { %s43_s19 = sadd.s32 1, %s1344_s23  ;;  %p50_p8 = scmp.ne.s32.totalorder %s1344_s23, %s1340_s22 }
  0x1c   : > { %s1640_s14 = smov (%p38_p7, %s36_s14), 0  ;;  %p51_p9 = scmp.eq.s32.totalorder %s1356_s26, 0 }
  0x1d   : > { %p56_p10 = scmp.ne.s32.totalorder %s1340_s22, %s1336_s21  ;;  %s40_s20 = ssub.s32 %s1352_s25, %s1640_s14 }
  0x1e   : > { %p187_p11 = scmp.eq.s32.totalorder %s925_s27, 1  ;;  %p41_p12 = scmp.eq.s32.totalorder %s40_s20, 0 }
  0x1f   : > { %p1490_p13 = por %p1436_p1, %p56_p10  ;;  %p193_p2 = scmp.eq.s32.totalorder %s926_s18, 1 }
  0x20   : > { %p1494_p0 = por %p187_p11, %p50_p8  ;;  %p52_p4 = por %p51_p9, %p50_p8 }
  0x21   : > { %s1499_s16 = scalar_select %p41_p12, %s1344_s23, %s43_s19  }
  0x22   : > { %p1501_p5 = por %p193_p2, %p56_p10  ;;  %s272_s30 = sand.u32 1, %s1344_s23  }
  0x23   : > { %s934_s27 = sshll.u32 %s1352_s25, 2  ;;  %p1036_p7 = scmp.lt.s32.totalorder %s1356_s26, 2 }
  0x24   : > { %s933_s9 = sshll.u32 %s272_s30, 2  ;;  %s280_s12 = scalar_lea.hbm %s1619_s0, %s934_s27 }
  0x25   : > { %s282_s13 = sshll.u32 %s280_s12, 4  ;;  %s276_s17 = scalar_lea.vmem [#allocation4], %s933_s9  ;;  %s283_s13 = int_to_ptr.hbm [resolvable:$true] %s282_s13 }
  0x26   : > { %s284_s20 = sshll.u32 %s276_s17, 4  ;;  %p1025_p11 = pnand %p1036_p7, %p52_p4  ;;  %s285_s20 = int_to_ptr.vmem [resolvable:$true] %s284_s20 }
  0x27   : > { %s273_s18 = scalar_lea.sflag [#allocation5], %s272_s30  ;;  %293 = sbr.rel (%p1444_p3) target bundleno = 1400 (0x578), region = 44 }
  0x28   : > { %1027 = dma.hbm_to_vmem [thread:$0]  (!%p1025_p11), %s283_s13, 64, %s285_s20, %s273_s18  }
  0x29   : > { %s1514_s19 = sand.u32 (!%p1444_p3), 1, %s1340_s22  }
  0x2a   : > { %s936_s1 = sshll.u32 (!%p1444_p3), %s1514_s19, 2  ;;  %s296_s7 = scalar_lea.sflag (!%p1444_p3), [#allocation5], %s1514_s19 }
  0x2b   : > { %s299_s27 = scalar_lea.vmem (!%p1444_p3), [#allocation4], %s936_s1 }
  0x2c   : > { %1319 = dma.done.wait (%p1490_p13), %s296_s7, 64  }
  0x2d   : > { %1321 = vsyncadd (%p1490_p13), %s296_s7, 4294967232 }
  0x2e   : > { %1323 = dma.done.wait (%p1436_p1), [#allocation8], 512  }
  0x2f   : > { %1325 = vsyncadd (%p1436_p1), [#allocation8], 4294966784 }
  0x30   : > { %1327 = dma.done.wait (%p1436_p1), [#allocation11], 512  }
  0x31   : > { %1329 = vsyncadd (%p1436_p1), [#allocation11], 4294966784  ;;  %v986_v0 = vld [vmem:[#allocation9 + $0x8] sm:$0xff]  ;;  %v990_v1 = vld [vmem:[#allocation7 + $0x8] sm:$0xff]  ;;  %vm371_vm0 = vcmask 261120   ;;  %vm389_vm1 = vcmask 257024  }
  0x32   : > { %381 = vmatpush.bf16.msra.mxu0 %v986_v0  ;;  %454 = vmatpush.bf16.msra.mxu2 %v990_v1  ;;  %v985_v2 = vld [vmem:[#allocation9] sm:$0xff]  ;;  %v989_v3 = vld [vmem:[#allocation7] sm:$0xff]  ;;  %v354_v4 = vld [vmem:[%s299_s27] sm:$0xf]  ;;  %vm465_vm2 = vcmask 64512   ;;  %s1364_s1 = smov 112  }
  0x33   : > { %v427_v5 = vld [vmem:[%s299_s27] sm:$0xf]  ;;  %s1365_s28 = smov 120   ;;  %s1366_s8 = smov 104   ;;  %v988_v19 = vld [vmem:[#allocation10 + $0x8] sm:$0xff]  ;;  %v987_v20 = vld [vmem:[#allocation10] sm:$0xff] }
  0x34   : > { %413 = vmatpush.bf16.msra.mxu1 %v988_v19  ;;  %vm500_vm3 = vcmask 1043456   ;;  %v518_v42 = vld [vmem:[#allocation12] sm:$0xf]  ;;  %s941_s11 = sshll.u32 %s1514_s19, 3  ;;  %s982_s30 = sshll.u32 %s1348_s24, 3 }
  0x35   : > { %v610_v44 = vsel %vm500_vm3, %v518_v42, 0  ;;  %s801_s12 = scalar_lea.hbm %s1625_s6, %s982_s30  ;;  %s348_s20 = scalar_lea.vmem [#allocation13], %s941_s11 }
  0x36   : > { %382 = vmatpush.bf16.msra.mxu0 %v985_v2  ;;  %455 = vmatpush.bf16.msra.mxu2 %v989_v3  ;;  %s803_s18 = sshll.u32 %s348_s20, 4  ;;  %s805_s7 = sshll.u32 %s801_s12, 4  ;;  %s804_s18 = int_to_ptr.vmem [resolvable:$true] %s803_s18  ;;  %s806_s7 = int_to_ptr.hbm [resolvable:$true] %s805_s7 }
  0x37   : > { %s790_s24 = scalar_lea.sflag [#allocation6], %s1514_s19  ;;  %s1280_s27 = sshra.s32 %s806_s7, 4  ;;  %s1281_s27 = int_to_ptr.hbm [resolvable:$true] %s1280_s27 }
  0x38   : > { %414 = vmatpush.bf16.msra.mxu1 %v987_v20  ;;  %s1286_s11 = scalar_lea.hbm %s1625_s6, 16  ;;  %p1287_p9 = scmp.lt.s32.totalorder %s1281_s27, %s1625_s6 }
  0x39   : > { %950 = vmatmul.msk.bf16.vlgmr.msra.gmra.mxu0 %vm371_vm0, %v354_v4  ;;  %968 = vmatmul.msk.bf16.vlgmr.msra.gmra.mxu2 %vm371_vm0, %v427_v5 }
  0x3b   : > { %959 = vmatmul.msk.bf16.vlgmr.msra.gmra.mxu1 %vm371_vm0, %v354_v4 }
  0xb6   : > { %v384_v6 = vpop.f32.mrf.mxu0 }
  0xb7   : > { %v388_v7 = vpack.c.bf16 %v384_v6, %v384_v6 }
  0xb8   : > { %v416_v29 = vpop.f32.mrf.mxu1 }
  0xb9   : > { %390 = vst.msk [vmem:[#allocation2] sm:$0xf] %vm389_vm1, %v388_v7  ;;  %v420_v30 = vpack.c.bf16 %v416_v29, %v416_v29  ;;  %v586_v7 = vld [vmem:[#allocation12 + $0x4] sm:$0xf] }
  0xbb   : > { %421 = vst.msk [vmem:[#allocation3] sm:$0xf] %vm389_vm1, %v420_v30 }
  0xbc   : > { %v457_v8 = vpop.f32.mrf.mxu2 }
  0xbd   : > { %v461_v9 = vmul.f32 0.125, %v457_v8  ;;  %v591_v8 = vsel %vm500_vm3, %v586_v7, 0 }
  0xbe   : > { %v386_v10 = vpop.f32.mrf.mxu0 }
  0xbf   : > { %v462_v12 = vpack.c.bf16 %v461_v9, %v461_v9 }
  0xc0   : > { %v463_v11 = vld [vmem:[#allocation2] sm:$0xf]  ;;  %v418_v31 = vpop.f32.mrf.mxu1 }
  0xc1   : > { %v470_v13 = vsel %vm465_vm2, %v463_v11, 0  ;;  %v525_v14 = vunpack.c.l.b16 %v463_v11  ;;  %v520_v17 = vunpack.c.l.b16 %v462_v12 }
  0xc2   : > { %479 = vmatpush.bf16.xpose.msra.mxu3 %v470_v13  ;;  %v464_v40 = vld [vmem:[#allocation3] sm:$0xf] }
  0xc3   : > { %v526_v15 = vpack.c.b16 %v525_v14, %v525_v14  ;;  %v521_v18 = vpack.c.b16 %v520_v17, %v520_v17  ;;  %v502_v41 = vsel %vm500_vm3, %v464_v40, 0  ;;  %v561_v55 = vunpack.c.l.b16 %v464_v40 }
  0xc4   : > { %v459_v16 = vpop.f32.mrf.mxu2  ;;  %511 = vmatpush.bf16.msrb.mxu0 %v502_v41 }
  0xc5   : > { %627 = vrot.lane.b32.xlu2 %v526_v15, %s1364_s1  ;;  %527 = vrot.lane.b32.xlu1 %v526_v15, %s1365_s28  ;;  %v562_v57 = vpack.c.b16 %v561_v55, %v561_v55  ;;  %v1099_v55 = vld [vmem:[%s1624_s5] ss:$0 sm:$0xff] }
  0xc8   : > { %619 = vmatpush.bf16.msra.mxu0 %v610_v44 }
  0xc9   : > { %969 = vmatmul.msk.bf16.vlgmr.msra.gmra.mxu3 %vm465_vm2, %v462_v12 }
  0xca   : > { %600 = vmatpush.bf16.msrb.mxu3 %v591_v8 }
  0xcd   : > { %706 = vrot.lane.b32.xlu2 %v526_v15, %s1366_s8  ;;  %522 = vrot.lane.b32.xlu1 %v521_v18, %s1365_s28 }
  0xd5   : > { %704 = vrot.lane.b32.xlu1 %v521_v18, %s1366_s8 }
 0x11f   : > { %v628_v21 = vpop.permute.xlu2 %627 }
 0x120   : > { %v633_v24 = vsel %vm465_vm2, %v628_v21, 0 }
 0x127   : > { %v707_v43 = vpop.permute.xlu2 %706 }
 0x128   : > { %v712_v54 = vsel %vm465_vm2, %v707_v43, 0 }
 0x137   : > { %v528_v22 = vpop.permute.xlu1 %527 }
 0x138   : > { %v533_v23 = vsel %vm465_vm2, %v528_v22, 0 }
 0x139   : > { %542 = vmatpush.bf16.xpose.msrb.mxu1 %v533_v23 }
 0x13f   : > { %v523_v25 = vpop.permute.xlu1 %522 }
 0x140   : > { %971 = vmatmul.msk.bf16.vlgmr.msrb.gmra.mxu1 %vm465_vm2, %v523_v25 }
 0x141   : > { %642 = vmatpush.bf16.xpose.msra.mxu1 %v633_v24 }
 0x147   : > { %v705_v6 = vpop.permute.xlu1 %704 }
 0x14c   : > { %v481_v26 = vpop.f32.mrf.mxu3 }
 0x14d   : > { %v485_v27 = vsel %vm465_vm2, %v481_v26, -inf }
 0x14e   : > { %486 = vmax.xlane.f32.xlu0 %v485_v27 }
 0x154   : > { %v483_v28 = vpop.f32.mrf.mxu3 }
 0x1bd   : > { %v544_v32 = vpop.f32.mrf.mxu1 }
 0x1be   : > { %v548_v33 = vsel %vm465_vm2, %v544_v32, -inf }
 0x1bf   : > { %549 = vmax.xlane.f32.xlu2 %v548_v33 }
 0x1c1   : > { %v487_v34 = vpop.xlane.xlu0 %486 }
 0x1c2   : > { %v488_v35 = vsub.f32 %v481_v26, %v487_v34 }
 0x1c4   : > { %v489_v36 = vmul.f32 1.442695, %v488_v35  ;;  %v683_v35 = vld [vmem:[#allocation12 + $0x8] sm:$0xf] }
 0x1c5   : > { %v546_v37 = vpop.f32.mrf.mxu1 }
 0x1c6   : > { %1100 = vpow2.f32 %v489_v36  ;;  %v688_v36 = vsel %vm500_vm3, %v683_v35, 0 }
 0x1c7   : > { %697 = vmatpush.bf16.msra.mxu3 %v688_v36 }
 0x1cc   : > { %v1101_v38 = vpop.eup %1100 }
 0x1cd   : > { %v491_v39 = vsel %vm465_vm2, %v1101_v38, 0.0 }
 0x1ce   : > { %492 = vadd.xlane.f32.xlu0 %v491_v39 }
 0x1e2   : > { %625 = vrot.lane.b32.xlu0 %v521_v18, %s1364_s1 }
 0x232   : > { %v550_v45 = vpop.xlane.xlu2 %549 }
 0x233   : > { %v551_v46 = vsub.f32 %v544_v32, %v550_v45 }
 0x235   : > { %v552_v47 = vmul.f32 1.442695, %v551_v46  ;;  %v762_v46 = vld [vmem:[#allocation12 + $0xc] sm:$0xf] }
 0x237   : > { %1102 = vpow2.f32 %v552_v47  ;;  %v767_v47 = vsel %vm500_vm3, %v762_v46, 0 }
 0x23d   : > { %v1103_v48 = vpop.eup %1102 }
 0x23e   : > { %v554_v49 = vsel %vm465_vm2, %v1103_v48, 0.0 }
 0x23f   : > { %555 = vadd.xlane.f32.xlu2 %v554_v49 }
 0x241   : > { %v493_v50 = vpop.xlane.xlu0 %492 }
 0x242   : > { %1104 = vrcp.f32 %v493_v50 }
 0x248   : > { %v1105_v51 = vpop.eup %1104 }
 0x249   : > { %v495_v52 = vmul.f32 %v1105_v51, %v1101_v38 }
 0x24b   : > { %v496_v53 = vpack.c.bf16 %v495_v52, %v495_v52 }
 0x24d   : > { %970 = vmatmul.msk.bf16.vlgmr.msrb.gmra.mxu0 %vm465_vm2, %v496_v53 }
 0x24e   : > { %721 = vmatpush.bf16.xpose.msrb.mxu0 %v712_v54 }
 0x254   : > { %v626_v56 = vpop.permute.xlu0 %625 }
 0x255   : > { %975 = vmatmul.msk.bf16.vlgmr.msra.gmra.mxu1 %vm465_vm2, %v626_v56 }
 0x257   : > { %563 = vrot.lane.b32.xlu2 %v562_v57, %s1365_s28 }
 0x2b2   : > { %v556_v58 = vpop.xlane.xlu2 %555 }
 0x2b3   : > { %1106 = vrcp.f32 %v556_v58 }
 0x2b9   : > { %v1107_v59 = vpop.eup %1106 }
 0x2ba   : > { %v558_v60 = vmul.f32 %v1107_v59, %v1103_v48  ;;  %v564_v61 = vpop.permute.xlu2 %563 }
 0x2bb   : > { %v569_v62 = vsel %vm500_vm3, %v564_v61, 0 }
 0x2bc   : > { %578 = vmatpush.bf16.msrb.mxu2 %v569_v62  ;;  %v559_v63 = vpack.c.bf16 %v558_v60, %v558_v60 }
 0x2bf   : > { %972 = vmatmul.msk.bf16.vlgmr.msrb.gmra.mxu2 %vm465_vm2, %v559_v63 }
 0x2ca   : > { %v513_v0 = vpop.f32.mrf.mxu0 }
 0x2cb   : > { %v517_v1 = vpack.c.bf16 %v513_v0, %v513_v0 }
 0x2cd   : > { %974 = vmatmul.msk.bf16.vlgmr.msra.gmra.mxu0 %vm465_vm2, %v517_v1 }
 0x2d2   : > { %v515_v2 = vpop.f32.mrf.mxu0  ;;  %v644_v3 = vpop.f32.mrf.mxu1 }
 0x2d3   : > { %v648_v4 = vsel %vm465_vm2, %v644_v3, -inf }
 0x2d4   : > { %649 = vmax.xlane.f32.xlu1 %v648_v4 }
 0x2da   : > { %v646_v5 = vpop.f32.mrf.mxu1 }
 0x2dd   : > { %978 = vmatmul.msk.bf16.vlgmr.msrb.gmra.mxu0 %vm465_vm2, %v705_v6 }
 0x342   : > { %v580_v9 = vpop.f32.mrf.mxu2 }
 0x343   : > { %v584_v10 = vpack.c.bf16 %v580_v9, %v580_v9 }
 0x345   : > { %973 = vmatmul.msk.bf16.vlgmr.msrb.gmra.mxu3 %vm465_vm2, %v584_v10 }
 0x347   : > { %v650_v11 = vpop.xlane.xlu1 %649 }
 0x348   : > { %v651_v12 = vsub.f32 %v644_v3, %v650_v11 }
 0x34a   : > { %v652_v13 = vmul.f32 1.442695, %v651_v12  ;;  %v582_v14 = vpop.f32.mrf.mxu2  ;;  %v621_v15 = vpop.f32.mrf.mxu0 }
 0x34c   : > { %1108 = vpow2.f32 %v652_v13 }
 0x352   : > { %v1109_v16 = vpop.eup %1108  ;;  %v623_v17 = vpop.f32.mrf.mxu0 }
 0x353   : > { %v654_v18 = vsel %vm465_vm2, %v1109_v16, 0.0 }
 0x354   : > { %655 = vadd.xlane.f32.xlu1 %v654_v18 }
 0x35a   : > { %v723_v19 = vpop.f32.mrf.mxu0 }
 0x35b   : > { %v727_v20 = vsel %vm465_vm2, %v723_v19, -inf }
 0x35c   : > { %728 = vmax.xlane.f32.xlu0 %v727_v20 }
 0x362   : > { %v725_v21 = vpop.f32.mrf.mxu0 }
 0x370   : > { %660 = vrot.lane.b32.xlu0 %v562_v57, %s1364_s1  ;;  %s1282_s1 = scalar_lea.hbm %s1281_s27, 8 }
 0x371   : > { %p1283_p1 = scmp.ne.s32.totalorder %s1281_s27, %s1282_s1  ;;  %p1288_p10 = scmp.lt.s32.totalorder %s1286_s11, %s1282_s1 }
 0x373   : > { %p1284_p3 = pnand %p1283_p1, %p1494_p0  ;;  %p1289_p12 = por %p1288_p10, %p1287_p9 }
 0x375   : > { %p1285_p8 = pneg %p1284_p3 }
 0x377   : > { %p1290_p13 = pnand %p1289_p12, %p1285_p8 }
 0x3c7   : > { %v656_v27 = vpop.xlane.xlu1 %655 }
 0x3c8   : > { %v602_v22 = vpop.f32.mrf.mxu3 }
 0x3c9   : > { %v622_v50 = vadd.f32 %v621_v15, %v602_v22 }
 0x3cf   : > { %v729_v23 = vpop.xlane.xlu0 %728 }
 0x3d0   : > { %v730_v24 = vsub.f32 %v723_v19, %v729_v23  ;;  %v604_v25 = vpop.f32.mrf.mxu3 }
 0x3d2   : > { %v731_v26 = vmul.f32 1.442695, %v730_v24 }
 0x3d4   : > { %1110 = vpow2.f32 %v731_v26 }
 0x3d5   : > { %1112 = vrcp.f32 %v656_v27 }
 0x3da   : > { %v1111_v28 = vpop.eup %1110 }
 0x3db   : > { %v733_v29 = vsel %vm465_vm2, %v1111_v28, 0.0  ;;  %v1113_v30 = vpop.eup %1112 }
 0x3dc   : > { %734 = vadd.xlane.f32.xlu1 %v733_v29  ;;  %v658_v31 = vmul.f32 %v1113_v30, %v1109_v16 }
 0x3de   : > { %v659_v34 = vpack.c.bf16 %v658_v31, %v658_v31 }
 0x3e2   : > { %v661_v32 = vpop.permute.xlu0 %660 }
 0x3e3   : > { %v666_v33 = vsel %vm500_vm3, %v661_v32, 0 }
 0x3e4   : > { %675 = vmatpush.bf16.msra.mxu2 %v666_v33 }
 0x3e7   : > { %976 = vmatmul.msk.bf16.vlgmr.msra.gmra.mxu2 %vm465_vm2, %v659_v34 }
 0x3e8   : > { %776 = vmatpush.bf16.msrb.mxu2 %v767_v47 }
 0x3f5   : > { %739 = vrot.lane.b32.xlu1 %v562_v57, %s1366_s8 }
 0x44f   : > { %v735_v37 = vpop.xlane.xlu1 %734 }
 0x450   : > { %1114 = vrcp.f32 %v735_v37 }
 0x456   : > { %v1115_v38 = vpop.eup %1114 }
 0x457   : > { %v737_v39 = vmul.f32 %v1115_v38, %v1111_v28 }
 0x459   : > { %v738_v42 = vpack.c.bf16 %v737_v39, %v737_v39 }
 0x467   : > { %v740_v40 = vpop.permute.xlu1 %739 }
 0x468   : > { %v745_v41 = vsel %vm500_vm3, %v740_v40, 0 }
 0x469   : > { %754 = vmatpush.bf16.msrb.mxu1 %v745_v41 }
 0x46a   : > { %v677_v43 = vpop.f32.mrf.mxu2 }
 0x46b   : > { %v681_v44 = vpack.c.bf16 %v677_v43, %v677_v43 }
 0x46c   : > { %979 = vmatmul.msk.bf16.vlgmr.msrb.gmra.mxu1 %vm465_vm2, %v738_v42 }
 0x46d   : > { %977 = vmatmul.msk.bf16.vlgmr.msra.gmra.mxu3 %vm465_vm2, %v681_v44 }
 0x472   : > { %v679_v45 = vpop.f32.mrf.mxu2 }
 0x4e9   : > { %v756_v48 = vpop.f32.mrf.mxu1 }
 0x4ea   : > { %v760_v49 = vpack.c.bf16 %v756_v48, %v756_v48 }
 0x4ec   : > { %980 = vmatmul.msk.bf16.vlgmr.msrb.gmra.mxu2 %vm465_vm2, %v760_v49 }
 0x4f0   : > { %v699_v51 = vpop.f32.mrf.mxu3 }
 0x4f1   : > { %v703_v52 = vadd.f32 %v699_v51, %v622_v50  ;;  %v758_v53 = vpop.f32.mrf.mxu1 }
 0x4f8   : > { %v701_v54 = vpop.f32.mrf.mxu3 }
 0x56f   : > { %v778_v56 = vpop.f32.mrf.mxu2 }
 0x570   : > { %v782_v57 = vadd.f32 %v778_v56, %v703_v52 }
 0x572   : > { %v787_v58 = vadd.f32 %v1099_v55, %v782_v57 }
 0x574   : > { %788 = vst.msk [vmem:[%s348_s20] sm:$0xff] %vm371_vm0, %v787_v58 }
 0x575   : > { %1293 = shalt.err (!%p1290_p13)
}
 0x576   : > { %1009 = dma.vmem_to_hbm [thread:$0]  (%p1494_p0), %s804_s18, 128, %s806_s7, %s790_s24  }
 0x577   : > { %v780_v59 = vpop.f32.mrf.mxu2 }
 0x578 PF: > { %s817_s19 = sand.u32 1, %s1336_s21   ;;  %p1029_p2 = pnand %p932_p6, %p1501_p5 }
 0x579   : > { %s818_s10 = scalar_lea.sflag [#allocation6], %s817_s19 }
 0x57a   : > { %p1030_p4 = pneg %p1029_p2 }
 0x57c   : > { %1331 = dma.done.wait (%p1030_p4), %s818_s10, 128  }
 0x57d   : > { %1333 = vsyncadd (%p1030_p4), %s818_s10, 4294967168  ;;  %s24_s26 = sadd.s32 1, %s1356_s26   ;;  %s1634_s21 = smov %s1340_s22 }
 0x57e   : > { %p21_p7 = scmp.ge.s32.totalorder %s24_s26, 4   ;;  %s1635_s22 = smov %s1344_s23 }
 0x57f   : > { %s1636_s23 = smov %s1499_s16  ;;  %s1637_s24 = smov %s1352_s25 }
 0x580   : > { %s1638_s25 = smov %s1640_s14  ;;  %23 = sbr.rel (!%p21_p7) target bundleno = 10 (0xa), region = 113 }
 0x585   :  { %824 = vsyncpa [#allocation5], 1 }
 0x586   :  { %826 = vsyncpa [#allocation5 + $0x1], 1 }
 0x587   :  { %827 = vsyncpa [#allocation8], 1 }
 0x588   :  { %828 = vsyncpa [#allocation11], 1 }
 0x589   :  { %829 = vsyncpa [#allocation6], 1 }
 0x58a   :  { %831 = vsyncpa [#allocation6 + $0x1], 1 }

</bundles_post_ra>
